<compile_context>
chip_gen: v6e
topology: v6e:2x2x1
jax: 0.10.0
libtpu: 0.0.40
codegen_flags: <defaults>
</compile_context>

<pallas_src>
import functools

import jax
import jax.numpy as jnp
from jax.experimental import pallas as pl
from jax.experimental.pallas import tpu as pltpu


def _upsample_jax(x, s):
    """Pure-JAX reference / fallback (mirrors torch view/expand/view, exact for any dtype)."""
    B, C, H, W = x.shape
    y = jnp.broadcast_to(x[:, :, :, None, :, None], (B, C, H, s, W, s))
    return y.reshape(B, C, H * s, W * s)


def _expand_kernel(e_ref, x_ref, o_ref, *, split):
    """One-hot 'gather' matmul: (TR, gW) @ (gW, g*s*W*s) -> (TR, g*s*W*s)."""
    e = e_ref[...]                                     # resident bf16 one-hot matrix
    dot = functools.partial(jnp.dot, preferred_element_type=jnp.float32)
    if not split:
        # bf16 input: value * 1.0 accumulated once in f32 -> bit exact, 1 MXU pass.
        y = dot(x_ref[...], e)
    else:
        # f32 / f16 input: exact 3-way bf16 split (x0 + x1 + x2 == x exactly; the last
        # residual spans <= 8 mantissa bits so it is bf16-representable), then sum the
        # three 1-pass matmuls in an order that keeps every partial sum exact.
        x = x_ref[...].astype(jnp.float32)
        x0 = x.astype(jnp.bfloat16)
        r1 = x - x0.astype(jnp.float32)
        x1 = r1.astype(jnp.bfloat16)
        x2 = (r1 - x1.astype(jnp.float32)).astype(jnp.bfloat16)
        y = (dot(x0, e) + dot(x1, e)) + dot(x2, e)
    o_ref[...] = y.astype(o_ref.dtype)                 # single full-tile, lane-dense store


def _pick_group(n_rows, W, s, k_max):
    """Input rows packed per lane-row: keep the packed output width lane-dense
    (>=256 lanes, multiple of 128 when possible) while the one-hot contraction
    dim g*W stays small enough that the MXU stays under the HBM roofline."""
    best, best_key = 1, None
    for g in range(1, n_rows + 1):
        if g > 1 and g * W > k_max:
            break
        if n_rows % g:
            continue
        out_w = g * W * s * s
        key = (out_w >= 256, out_w % 128 == 0, -g)     # dense first, then cheap
        if best_key is None or key > best_key:
            best, best_key = g, key
    return best


def _pick_rows_per_block(nr, out_row_bytes, target_bytes=4 * 1024 * 1024):
    """Packed rows per grid step: multiple of 8, divides nr, grid >= 2 (prefer an even
    grid for v7x megacore balance), output block capped at ~target_bytes."""
    cap = min(nr, max(8, target_bytes // max(out_row_bytes, 1)))
    best, best_key = None, None
    for t in range(8, cap + 1, 8):
        if nr % t == 0 and nr // t >= 2:
            key = ((nr // t) % 2 == 0, t)
            if best_key is None or key > best_key:
                best, best_key = t, key
    return best if best is not None else nr            # tiny inputs: single step


@functools.partial(jax.jit, static_argnames=("stride",))
def upsample_expand(x, stride: int = 2):
    """Nearest-neighbour upsample by `stride`, matching torch Upsample_expand exactly."""
    assert x.ndim == 4
    s = int(stride)
    B, C, H, W = x.shape
    if s == 1 or x.size == 0:
        return _upsample_jax(x, s)

    dt = x.dtype
    if dt == jnp.bfloat16:
        split = False
    elif dt in (jnp.float32, jnp.float16):
        split = True
    else:
        # TODO(synk): integer / 64-bit dtypes need a non-MXU exact Pallas path;
        # use the exact XLA broadcast instead of risking MXU rounding.
        return _upsample_jax(x, s)

    n_rows = B * C * H
    k_max = 192 if split else 256                      # keeps MXU under HBM roofline on v5e
    g = _pick_group(n_rows, W, s, k_max)
    gW = g * W
    out_w = g * W * s * s

    # One-hot matrix too large to keep resident in VMEM (very large W).
    # TODO(synk): W-tiled Pallas variant for very large widths.
    if gW * out_w * 2 > 4 * 1024 * 1024:
        return _upsample_jax(x, s)

    nr = n_rows // g
    x2 = x.reshape(nr, gW)                             # free row-major reshape (no transpose)

    out_row_bytes = out_w * jnp.dtype(dt).itemsize
    tr = _pick_rows_per_block(nr, out_row_bytes)

    # Combined row+column expansion one-hot (hoisted out of the kernel; its block index
    # never changes so it is DMA'd once and stays resident).  0/1 is exact in bf16.
    p = jnp.arange(out_w, dtype=jnp.int32)
    src = (p // (s * W * s)) * W + (p % (W * s)) // s
    e = (src[None, :] == jnp.arange(gW, dtype=jnp.int32)[:, None]).astype(jnp.bfloat16)

    out2 = pl.pallas_call(
        functools.partial(_expand_kernel, split=split),
        out_shape=jax.ShapeDtypeStruct((nr, out_w), dt),
        grid_spec=pltpu.PrefetchScalarGridSpec(
            num_scalar_prefetch=0,
            grid=(pl.cdiv(nr, tr),),                   # tr divides nr by construction
            in_specs=[
                pl.BlockSpec((gW, out_w), lambda i: (0, 0)),   # resident one-hot
                pl.BlockSpec((tr, gW), lambda i: (i, 0)),
            ],
            out_specs=pl.BlockSpec((tr, out_w), lambda i: (i, 0)),
        ),
        compiler_params=pltpu.CompilerParams(
            dimension_semantics=("parallel",),
            vmem_limit_bytes=48 * 1024 * 1024,
        ),
    )(e, x2)

    return out2.reshape(B, C, H * s, W * s)            # free row-major reshape


if __name__ == "__main__":
    key = jax.random.PRNGKey(0)
    stride = 2
    B, C, H, W = 2, 4, 16, 16

    # f32: exercises the exact 3-way bf16-split MXU path.
    x = jax.random.normal(key, (B, C, H, W), dtype=jnp.float32)
    out = jax.block_until_ready(upsample_expand(x, stride=stride))
    ref = _upsample_jax(x, stride)
    assert out.shape == (B, C, H * stride, W * stride), out.shape
    assert out.dtype == x.dtype
    assert bool(jnp.array_equal(out, ref)), "f32 mismatch (upsample must be a bit-exact copy)"

    # bf16: exercises the native 1-pass MXU path.
    xb = x.astype(jnp.bfloat16)
    outb = jax.block_until_ready(upsample_expand(xb, stride=stride))
    assert bool(jnp.array_equal(outb, _upsample_jax(xb, stride))), "bf16 mismatch"

    # Wider W (already lane-dense, g=1) and an odd-size stride-3 case.
    x2 = jax.random.normal(jax.random.PRNGKey(1), (1, 2, 8, 128), dtype=jnp.float32)
    assert bool(jnp.array_equal(jax.block_until_ready(upsample_expand(x2, stride=2)),
                                _upsample_jax(x2, 2))), "wide-W mismatch"
    x3 = jax.random.normal(jax.random.PRNGKey(2), (2, 3, 8, 10), dtype=jnp.float32)
    assert bool(jnp.array_equal(jax.block_until_ready(upsample_expand(x3, stride=3)),
                                _upsample_jax(x3, 3))), "stride-3 mismatch"

    print("KERNEL_OK")
</pallas_src>

<mosaic_0001>
module attributes {stable_mosaic.version = 11 : i64} {
  func.func @_expand_kernel(%arg0: i32, %arg1: memref<64x256xbf16, #tpu.memory_space<vmem>>, %arg2: memref<16x64xf32, #tpu.memory_space<vmem>>, %arg3: memref<16x256xf32, #tpu.memory_space<vmem>>) attributes {dimension_semantics = [#tpu.dimension_semantics<parallel>], iteration_bounds = array<i64: 2>, scalar_prefetch = 0 : i64, scratch_operands = 0 : i64, tpu.core_type = #tpu.core_type<tc>, window_params = [{pipeline_mode = #tpu.pipeline_mode<synchronous>, transform_indices = @transform_0, window_bounds = array<i64: 64, 256>}, {transform_indices = @transform_1, window_bounds = array<i64: 16, 64>}, {transform_indices = @transform_2, window_bounds = array<i64: 16, 256>}]} {
    %c0 = arith.constant 0 : index
    %c0_0 = arith.constant 0 : index
    %0 = vector.load %arg1[%c0, %c0_0] : memref<64x256xbf16, #tpu.memory_space<vmem>>, vector<64x256xbf16>
    %c0_1 = arith.constant 0 : index
    %c0_2 = arith.constant 0 : index
    %1 = vector.load %arg2[%c0_1, %c0_2] : memref<16x64xf32, #tpu.memory_space<vmem>>, vector<16x64xf32>
    %2 = arith.truncf %1 : vector<16x64xf32> to vector<16x64xbf16>
    %3 = arith.extf %2 : vector<16x64xbf16> to vector<16x64xf32>
    %4 = arith.subf %1, %3 : vector<16x64xf32>
    %5 = arith.truncf %4 : vector<16x64xf32> to vector<16x64xbf16>
    %6 = arith.extf %5 : vector<16x64xbf16> to vector<16x64xf32>
    %7 = arith.subf %4, %6 : vector<16x64xf32>
    %8 = arith.truncf %7 : vector<16x64xf32> to vector<16x64xbf16>
    %cst = arith.constant dense<0.000000e+00> : vector<16x256xf32>
    %9 = tpu.matmul %2, %0, %cst {dimension_numbers = #tpu.dot_dimension_numbers<[1], [0], [0], [1], [0, 0, 1, 1], [], []>} : vector<16x64xbf16>, vector<64x256xbf16>, vector<16x256xf32> -> vector<16x256xf32>
    %cst_3 = arith.constant dense<0.000000e+00> : vector<16x256xf32>
    %10 = tpu.matmul %5, %0, %cst_3 {dimension_numbers = #tpu.dot_dimension_numbers<[1], [0], [0], [1], [0, 0, 1, 1], [], []>} : vector<16x64xbf16>, vector<64x256xbf16>, vector<16x256xf32> -> vector<16x256xf32>
    %11 = arith.addf %9, %10 : vector<16x256xf32>
    %cst_4 = arith.constant dense<0.000000e+00> : vector<16x256xf32>
    %12 = tpu.matmul %8, %0, %cst_4 {dimension_numbers = #tpu.dot_dimension_numbers<[1], [0], [0], [1], [0, 0, 1, 1], [], []>} : vector<16x64xbf16>, vector<64x256xbf16>, vector<16x256xf32> -> vector<16x256xf32>
    %13 = arith.addf %11, %12 : vector<16x256xf32>
    %c0_5 = arith.constant 0 : index
    %c0_6 = arith.constant 0 : index
    %14 = vector.load %arg3[%c0_5, %c0_6] : memref<16x256xf32, #tpu.memory_space<vmem>>, vector<16x256xf32>
    tpu.vector_store %arg3[%c0_5, %c0_6], %13 {strides = array<i32>} : memref<16x256xf32, #tpu.memory_space<vmem>>, vector<16x256xf32>,
    return
  }
  func.func @transform_0(%arg0: i32) -> (i32, i32) {
    %c0_i32 = arith.constant 0 : i32
    %c0_i32_0 = arith.constant 0 : i32
    %c0_i32_1 = arith.constant 0 : i32
    return %c0_i32, %c0_i32_0 : i32, i32
  }
  func.func @transform_1(%arg0: i32) -> (i32, i32) {
    %c0_i32 = arith.constant 0 : i32
    %c0_i32_0 = arith.constant 0 : i32
    return %arg0, %c0_i32 : i32, i32
  }
  func.func @transform_2(%arg0: i32) -> (i32, i32) {
    %c0_i32 = arith.constant 0 : i32
    %c0_i32_0 = arith.constant 0 : i32
    return %arg0, %c0_i32 : i32, i32
  }
}

</mosaic_0001>

<bundles_post_ra>
// kernel: upsample_expand.1
= control target key start
LH: loop header
LB: loop body
LE: loop exit
PB: predicated region body
PF: predicated region fallthrough
CT: control target
= control target key end

     0   :  { %s485_s9 = smov 0   ;;  %s533_s0 = inlined_call_operand.vmem [shape: bf16[64,256], index: 0, kind: input, shape index: {}]   ;;  %s534_s1 = inlined_call_operand.vmem [shape: f32[32,64], index: 1, kind: input, shape index: {}]   ;;  %s535_s2 = inlined_call_operand.vmem [shape: f32[32,256], index: 2, kind: output, shape index: {}]  }
   0x1 LB: > { %s416_s10 = sadd.s32 4294967295, %s467_s9   ;;  %p420_p0 = scmp.ge.s32.totalorder %s467_s9, 1  ;;  %s467_s9 = sphi %s485_s9, %s12_s9  }
   0x2   : > { %p113_p1 = scmp.lt.s32.totalorder %s467_s9, 3 }
   0x4   : > { %p114_p2 = pnand %p420_p0, %p113_p1 }
   0x5   : > { %s421_s13 = sshll.u32 (!%p114_p2), %s416_s10, 1 }
   0x6   : > { %117 = sbr.rel (%p114_p2) target bundleno = 247 (0xf7), region = 28  ;;  %p137_p3 = scmp.lt.s32.totalorder (!%p114_p2), %s421_s13, 3 }
   0xb   : > { %v449_v0 = vld [vmem:[%s533_s0 + $0x34] ss:$8 sps:$4 sm:$0xff]   ;;  %v451_v1 = vld [vmem:[%s533_s0 + $0x30] ss:$8 sps:$4 sm:$0xff]   ;;  %v469_v2 = vmov 0   ;;  %s537_s13 = smov (!%p137_p3, %s421_s13), 3 }
   0xc   : > { %247 = vmatprep.mubr.bf16.mxu0 %v469_v2  ;;  %293 = vmatprep.mubr.bf16.mxu1 %v469_v2  ;;  %v452_v3 = vld [vmem:[%s533_s0 + $0x24] ss:$8 sps:$4 sm:$0xff]   ;;  %v454_v4 = vld [vmem:[%s533_s0 + $0x20] ss:$8 sps:$4 sm:$0xff]   ;;  %v455_v5 = vld [vmem:[%s533_s0 + $0x14] ss:$8 sps:$4 sm:$0xff]  }
   0xd   : > { %223 = vmatprep.subr.bf16.mxu0 %v449_v0  ;;  %269 = vmatprep.subr.bf16.mxu1 %v449_v0  ;;  %s422_s22 = sshll.u32 %s537_s13, 3  ;;  %v457_v6 = vld [vmem:[%s533_s0 + $0x10] ss:$8 sps:$4 sm:$0xff]   ;;  %v458_v9 = vld [vmem:[%s533_s0 + $0x4] ss:$8 sps:$4 sm:$0xff]   ;;  %vm211_vm0 = vcmask 523264  }
   0xe   : > { %224 = vmatpush1.bf16.msra.mxu0 %v451_v1  ;;  %270 = vmatpush1.bf16.msra.mxu1 %v451_v1  ;;  %s140_s25 = scalar_lea.vmem %s534_s1, %s422_s22  ;;  %v460_v13 = vld [vmem:[%s533_s0] ss:$8 sps:$4 sm:$0xff]   ;;  %s439_s4 = sshll.u32 %s537_s13, 4 }
   0xf   : > { %225 = vmatprep.subr.bf16.mxu0 %v452_v3  ;;  %271 = vmatprep.subr.bf16.mxu1 %v452_v3  ;;  %v158_v7 = vld [vmem:[%s140_s25] sm:$0xff]  ;;  %v159_v8 = vld [vmem:[%s140_s25 + $0x8] sm:$0xff]  ;;  %s147_s7 = scalar_lea.vmem %s535_s2, %s439_s4 }
  0x10   : > { %v160_v10 = vpack.c.bf16 %v159_v8, %v158_v7 }
  0x12   : > { %226 = vmatpush1.bf16.msra.mxu0 %v454_v4  ;;  %272 = vmatpush1.bf16.msra.mxu1 %v454_v4  ;;  %v161_v11 = vunpack.c.l.bf16 %v160_v10  ;;  %v162_v12 = vunpack.c.h.bf16 %v160_v10 }
  0x13   : > { %227 = vmatprep.subr.bf16.mxu0 %v455_v5  ;;  %273 = vmatprep.subr.bf16.mxu1 %v455_v5 }
  0x14   : > { %v163_v14 = vsub.f32 %v158_v7, %v161_v11  ;;  %v164_v15 = vsub.f32 %v159_v8, %v162_v12 }
  0x16   : > { %228 = vmatpush1.bf16.msra.mxu0 %v457_v6  ;;  %274 = vmatpush1.bf16.msra.mxu1 %v457_v6  ;;  %v165_v16 = vpack.c.bf16 %v164_v15, %v163_v14 }
  0x17   : > { %229 = vmatprep.subr.bf16.mxu0 %v458_v9  ;;  %275 = vmatprep.subr.bf16.mxu1 %v458_v9 }
  0x18   : > { %v166_v17 = vunpack.c.l.bf16 %v165_v16  ;;  %v167_v18 = vunpack.c.h.bf16 %v165_v16 }
  0x1a   : > { %230 = vmatpush1.bf16.msra.mxu0 %v460_v13  ;;  %276 = vmatpush1.bf16.msra.mxu1 %v460_v13  ;;  %v168_v19 = vsub.f32 %v163_v14, %v166_v17  ;;  %v169_v20 = vsub.f32 %v164_v15, %v167_v18 }
  0x1b   : > { %315 = vmatprep.subr.bf16.mxu0 %v449_v0 }
  0x1c   : > { %v170_v21 = vpack.c.bf16 %v169_v20, %v168_v19 }
  0x1d   : > { %434 = vmatmul.mubr.msk.bf16.vlgmr.msra.gmra.mxu0 %vm211_vm0, %v165_v16  ;;  %435 = vmatmul.mubr.msk.bf16.vlgmr.msra.gmra.mxu1 %vm211_vm0, %v160_v10 }
  0x1e   : > { %316 = vmatpush1.bf16.msra.mxu0 %v451_v1  ;;  %339 = vmatprep.mubr.bf16.mxu0 %v469_v2 }
  0x1f   : > { %317 = vmatprep.subr.bf16.mxu0 %v452_v3 }
  0x22   : > { %318 = vmatpush1.bf16.msra.mxu0 %v454_v4 }
  0x23   : > { %319 = vmatprep.subr.bf16.mxu0 %v455_v5 }
  0x26   : > { %320 = vmatpush1.bf16.msra.mxu0 %v457_v6 }
  0x27   : > { %321 = vmatprep.subr.bf16.mxu0 %v458_v9 }
  0x2a   : > { %322 = vmatpush1.bf16.msra.mxu0 %v460_v13 }
  0x2d   : > { %436 = vmatmul.mubr.msk.bf16.vlgmr.msra.gmra.mxu0 %vm211_vm0, %v170_v21 }
  0xdd   : > { %v249_v22 = vpop.f32.mrf.mxu0  ;;  %v295_v23 = vpop.f32.mrf.mxu1 }
  0xde   : > { %v296_v29 = vadd.f32 %v295_v23, %v249_v22 }
  0xdf   : > { %v251_v24 = vpop.f32.mrf.mxu0  ;;  %v297_v25 = vpop.f32.mrf.mxu1 }
  0xe0   : > { %v298_v31 = vadd.f32 %v297_v25, %v251_v24 }
  0xe1   : > { %v253_v26 = vpop.f32.mrf.mxu0  ;;  %v299_v27 = vpop.f32.mrf.mxu1 }
  0xe2   : > { %v300_v35 = vadd.f32 %v299_v27, %v253_v26 }
  0xe3   : > { %v255_v28 = vpop.f32.mrf.mxu0  ;;  %v301_v33 = vpop.f32.mrf.mxu1 }
  0xe4   : > { %v302_v38 = vadd.f32 %v301_v33, %v255_v28 }
  0xed   : > { %v341_v30 = vpop.f32.mrf.mxu0 }
  0xee   : > { %v350_v32 = vadd.f32 %v341_v30, %v296_v29 }
  0xef   : > { %v343_v34 = vpop.f32.mrf.mxu0 }
  0xf0   : > { %354 = vst [vmem:[%s147_s7] sm:$0xff] %v350_v32  ;;  %v351_v36 = vadd.f32 %v343_v34, %v298_v31 }
  0xf1   : > { %v345_v37 = vpop.f32.mrf.mxu0 }
  0xf2   : > { %355 = vst [vmem:[%s147_s7 + $0x8] sm:$0xff] %v351_v36  ;;  %v352_v39 = vadd.f32 %v345_v37, %v300_v35 }
  0xf3   : > { %v347_v40 = vpop.f32.mrf.mxu0 }
  0xf4   : > { %356 = vst [vmem:[%s147_s7 + $0x10] sm:$0xff] %v352_v39  ;;  %v353_v41 = vadd.f32 %v347_v40, %v302_v38 }
  0xf6   : > { %357 = vst [vmem:[%s147_s7 + $0x18] sm:$0xff] %v353_v41 }
  0xf7 PF: > { %s12_s9 = sadd.s32 1, %s467_s9  }
  0xf8   : > { %p9_p4 = scmp.ge.s32.totalorder %s12_s9, 4  }
  0xfa   :  { %11 = sbr.rel (!%p9_p4) target bundleno = 1 (0x1), region = 58 }

</bundles_post_ra>
